<compile_context>
chip_gen: v7x
topology: tpu7x:2x2x1
jax: 0.10.0
libtpu: 0.0.40
codegen_flags: <defaults>
</compile_context>

<pallas_src>
import functools

import jax
import jax.numpy as jnp
from jax.experimental import pallas as pl
from jax.experimental.pallas import tpu as pltpu


def _channel_shuffle_kernel(x_ref, o_ref, *, groups, cpg):
    # x_ref / o_ref: (C, T) VMEM tiles, spatial (lane-dense) on the last axis.
    # One vectorized sublane permutation of the whole tile:
    #     out[k * groups + g, :] = in[g * cpg + k, :]
    c, t = x_ref.shape
    x = x_ref[...]
    o_ref[...] = x.reshape(groups, cpg, t).swapaxes(0, 1).reshape(c, t)


@functools.lru_cache(maxsize=1)
def _vmem_config():
    """Per-generation (vmem_limit_bytes, tile working-set budget)."""
    try:
        cap = int(pltpu.get_tpu_info().vmem_capacity_bytes)
    except Exception:
        cap = 64 * 1024 * 1024  # conservative default (v7x per-TC VMEM)
    if cap >= 128 * 1024 * 1024:
        # v5e / v6e: 128 MiB physical VMEM -> generous scoped limit.
        limit = 64 * 1024 * 1024
    else:
        # v7x: 64 MiB per TensorCore -> stay well under the physical ceiling.
        limit = min(48 * 1024 * 1024, (3 * cap) // 4)
    budget = (2 * limit) // 3  # headroom for (in + out) x double-buffer
    return limit, budget


def _plan_hw_tiling(hw, c, itemsize, budget_bytes, n):
    """Return (hw_eff, tile).  hw_eff >= hw; hw_eff == hw means no padding.

    Guarantees: tile == hw_eff (full extent) or tile % 128 == 0 and
    hw_eff % tile == 0, and (in + out) x double-buffer fits the budget
    (except in the degenerate huge-C fallback where the 128-lane floor is
    used and the explicit vmem_limit still bounds the compiler).
    """

    def fits(t):
        return 4 * c * t * itemsize <= budget_bytes  # in + out, 2 buffers each

    if hw % 128 != 0:
        if fits(hw):
            return hw, hw  # full-extent lane block: legal and within budget
        # Pad H*W to the next multiple of 128 so a small, legal tile exists.
        hw_eff = ((hw + 127) // 128) * 128
    else:
        hw_eff = hw

    cands = [t for t in range(128, hw_eff + 1, 128)
             if hw_eff % t == 0 and fits(t)]
    if not cands:
        return hw_eff, 128  # extreme channel counts; minimum legal lane tile

    # Keep >= 2 total grid steps (pipelining + v7x second core) when batch==1.
    min_hw_steps = 2 if n == 1 else 1
    good = [t for t in cands if hw_eff // t >= min_hw_steps]
    return hw_eff, (max(good) if good else max(cands))


@functools.lru_cache(maxsize=None)
def _make_shuffle_call(n, c, hw, t, groups, dtype, vmem_limit_bytes):
    cpg = c // groups
    kernel = functools.partial(_channel_shuffle_kernel, groups=groups, cpg=cpg)
    return pl.pallas_call(
        kernel,
        out_shape=jax.ShapeDtypeStruct((n, c, hw), dtype),
        grid=(n, hw // t),
        in_specs=[pl.BlockSpec((None, c, t), lambda i, j: (i, 0, j))],
        out_specs=pl.BlockSpec((None, c, t), lambda i, j: (i, 0, j)),
        compiler_params=pltpu.CompilerParams(
            dimension_semantics=("parallel", "parallel"),
            vmem_limit_bytes=vmem_limit_bytes,
        ),
    )


def channel_shuffle(x, groups, *, hw_tile=None):
    """ChannelShuffle forward.  x: (N, C, H, W) -> (N, C, H, W), NCHW."""
    n, c, h, w = x.shape
    if c % groups != 0:
        raise ValueError(f"channels {c} not divisible by groups {groups}")
    if groups == 1:
        return x

    hw = h * w
    dtype = jnp.dtype(x.dtype)
    itemsize = dtype.itemsize
    vmem_limit, budget = _vmem_config()

    if hw_tile is not None:
        t = int(hw_tile)
        if not (t == hw or (hw % t == 0 and t % 128 == 0)):
            raise ValueError(
                "hw_tile must equal H*W or be a multiple of 128 that divides H*W")
        hw_eff = hw
    else:
        hw_eff, t = _plan_hw_tiling(hw, c, itemsize, budget, n)

    x2 = x.reshape(n, c, hw)  # collapse trailing dims: free metadata view
    if hw_eff != hw:
        x2 = jnp.pad(x2, ((0, 0), (0, 0), (0, hw_eff - hw)))

    call = _make_shuffle_call(n, c, hw_eff, t, groups, dtype, vmem_limit)
    y = call(x2)

    if hw_eff != hw:
        y = y[:, :, :hw]
    return y.reshape(n, c, h, w)


def channel_shuffle_ref(x, groups):
    # Pure-JAX reference mirroring the PyTorch view/transpose/view sequence.
    n, c, h, w = x.shape
    return x.reshape(n, groups, c // groups, h, w).swapaxes(1, 2).reshape(n, c, h, w)


if __name__ == "__main__":
    key = jax.random.PRNGKey(0)

    # Small shape consistent with the module: NCHW, channels divisible by groups.
    x = jax.random.normal(key, (2, 4, 16, 16), dtype=jnp.float32)
    y = channel_shuffle(x, groups=2)
    jax.block_until_ready(y)
    assert y.shape == x.shape
    assert bool(jnp.array_equal(y, channel_shuffle_ref(x, 2)))

    # Wider, multi-tile configuration (explicit hw_tile) -> grid = (2, 8).
    x2 = jax.random.normal(jax.random.fold_in(key, 1), (2, 48, 32, 32), dtype=jnp.float32)
    y2 = channel_shuffle(x2, groups=4, hw_tile=128)
    jax.block_until_ready(y2)
    assert bool(jnp.array_equal(y2, channel_shuffle_ref(x2, 4)))

    # batch == 1: planner must split H*W into >= 2 spatial tiles (grid = (1, 2)).
    x3 = jax.random.normal(jax.random.fold_in(key, 2), (1, 16, 16, 16), dtype=jnp.float32)
    y3 = channel_shuffle(x3, groups=4)
    jax.block_until_ready(y3)
    assert bool(jnp.array_equal(y3, channel_shuffle_ref(x3, 4)))

    # Non-multiple-of-128 spatial extent (full-extent lane block path).
    x4 = jax.random.normal(jax.random.fold_in(key, 3), (1, 8, 10, 10), dtype=jnp.float32)
    y4 = channel_shuffle(x4, groups=2)
    jax.block_until_ready(y4)
    assert bool(jnp.array_equal(y4, channel_shuffle_ref(x4, 2)))

    # Packed dtype (bf16): vectorized permutation keeps full-width stores.
    x5 = jax.random.normal(jax.random.fold_in(key, 4), (1, 32, 16, 16), dtype=jnp.bfloat16)
    y5 = channel_shuffle(x5, groups=4)
    jax.block_until_ready(y5)
    assert bool(jnp.array_equal(y5, channel_shuffle_ref(x5, 4)))

    print("KERNEL_OK")
</pallas_src>

<mosaic_0001>
module attributes {stable_mosaic.version = 11 : i64} {
  func.func @_channel_shuffle_kernel(%arg0: i32, %arg1: i32, %arg2: memref<1x4x256xf32, #tpu.memory_space<vmem>>, %arg3: memref<1x4x256xf32, #tpu.memory_space<vmem>>) attributes {dimension_semantics = [#tpu.dimension_semantics<parallel>, #tpu.dimension_semantics<parallel>], iteration_bounds = array<i64: 2, 1>, scalar_prefetch = 0 : i64, scratch_operands = 0 : i64, tpu.core_type = #tpu.core_type<tc>, window_params = [{transform_indices = @transform_0, window_bounds = array<i64: 1, 4, 256>}, {transform_indices = @transform_1, window_bounds = array<i64: 1, 4, 256>}]} {
    %c0 = arith.constant 0 : index
    %c0_0 = arith.constant 0 : index
    %c0_1 = arith.constant 0 : index
    %0 = vector.load %arg2[%c0, %c0_0, %c0_1] : memref<1x4x256xf32, #tpu.memory_space<vmem>>, vector<1x4x256xf32>
    %1 = vector.shape_cast %0 : vector<1x4x256xf32> to vector<4x256xf32>
    %2 = vector.shape_cast %1 : vector<4x256xf32> to vector<2x2x256xf32>
    %3 = tpu.transpose %2, [1, 0, 2] : vector<2x2x256xf32> -> vector<2x2x256xf32>
    %4 = vector.shape_cast %3 : vector<2x2x256xf32> to vector<4x256xf32>
    %c0_2 = arith.constant 0 : index
    %c0_3 = arith.constant 0 : index
    %c0_4 = arith.constant 0 : index
    %5 = vector.load %arg3[%c0_2, %c0_3, %c0_4] : memref<1x4x256xf32, #tpu.memory_space<vmem>>, vector<1x4x256xf32>
    %6 = vector.shape_cast %5 : vector<1x4x256xf32> to vector<4x256xf32>
    %7 = vector.shape_cast %4 : vector<4x256xf32> to vector<1x4x256xf32>
    tpu.vector_store %arg3[%c0_2, %c0_3, %c0_4], %7 {strides = array<i32>} : memref<1x4x256xf32, #tpu.memory_space<vmem>>, vector<1x4x256xf32>,
    return
  }
  func.func @transform_0(%arg0: i32, %arg1: i32) -> (i32, i32, i32) {
    %c0_i32 = arith.constant 0 : i32
    %c0_i32_0 = arith.constant 0 : i32
    return %arg0, %c0_i32, %arg1 : i32, i32, i32
  }
  func.func @transform_1(%arg0: i32, %arg1: i32) -> (i32, i32, i32) {
    %c0_i32 = arith.constant 0 : i32
    %c0_i32_0 = arith.constant 0 : i32
    return %arg0, %c0_i32, %arg1 : i32, i32, i32
  }
}

</mosaic_0001>

<bundles_post_ra>
// kernel: tpu_custom_call.1
= control target key start
LH: loop header
LB: loop body
LE: loop exit
PB: predicated region body
PF: predicated region fallthrough
CT: control target
= control target key end

     0   :  { %6 = vsyncpa [#allocation3], 0  ;;  %s670_s0 = inlined_call_operand.hbm [shape: f32[2,4,256], index: 0, kind: input, shape index: {}]   ;;  %s671_s1 = inlined_call_operand.hbm [shape: f32[2,4,256], index: 1, kind: output, shape index: {}]  }
   0x1   :  { %8 = vsyncpa [#allocation3 + $0x1], 0 }
   0x2   :  { %9 = vsyncpa [#allocation4], 0 }
   0x3   :  { %11 = vsyncpa [#allocation4 + $0x1], 0  ;;  %s498_s6 = smov 0   ;;  %s500_s7 = smov 0  }
   0x4   :  { %s502_s8 = smov 0   ;;  %s504_s9 = smov 0  }
   0x5   :  { %s506_s10 = smov 0   ;;  %s508_s11 = smov 0  }
   0x6 LB: > { %s287_s12 = sadd.s32 4294967295, %s482_s11   ;;  %s288_s13 = sadd.s32 4294967294, %s482_s11   ;;  %s482_s11 = sphi %s508_s11, %s17_s11   ;;  %s478_s10 = sphi %s506_s10, %s687_s10   ;;  %s474_s9 = sphi %s504_s9, %s686_s9   ;;  %s470_s8 = sphi %s502_s8, %s685_s8   ;;  %s466_s7 = sphi %s500_s7, %s684_s7   ;;  %s462_s6 = sphi %s498_s6, %s683_s6  }
   0x7   : > { %s29_s14 = sadd.s32 1, %s478_s10  ;;  %s38_s15 = sadd.s32 1, %s470_s8 }
   0x8   : > { %p31_p0 = scmp.ge.s32.totalorder %s29_s14, 2  ;;  %p45_p1 = scmp.ne.s32.totalorder %s470_s8, %s466_s7 }
   0x9   : > { %p46_p2 = scmp.eq.s32.totalorder %s482_s11, 0  ;;  %p51_p3 = scmp.ne.s32.totalorder %s466_s7, %s462_s6 }
   0xa   : > { %s689_s14 = smov (%p31_p0, %s29_s14), 0  ;;  %p52_p5 = scmp.eq.s32.totalorder %s287_s12, 0 }
   0xb   : > { %p539_p4 = por %p46_p2, %p45_p1  ;;  %s33_s17 = ssub.s32 %s478_s10, %s689_s14 }
   0xc   : > { %p77_p6 = scmp.eq.s32.totalorder %s287_s12, 1  ;;  %p36_p7 = scmp.eq.s32.totalorder %s33_s17, 0 }
   0xd   : > { %p545_p8 = por %p52_p5, %p51_p3  ;;  %p83_p10 = scmp.eq.s32.totalorder %s288_s13, 1 }
   0xe   : > { %p549_p9 = por %p77_p6, %p45_p1  ;;  %p318_p13 = scmp.lt.s32.totalorder %s482_s11, 2 }
   0xf   : > { %s554_s20 = scalar_select %p36_p7, %s470_s8, %s38_s15  }
  0x10   : > { %s675_s19 = scalar_select %p549_p9, 1, 0 }
  0x11   : > { %p556_p11 = por %p83_p10, %p51_p3  ;;  %s103_s22 = sand.u32 1, %s470_s8  }
  0x12   : > { %s291_s23 = sshll.u32 %s103_s22, 3  ;;  %s304_s24 = sshll.u32 %s478_s10, 7 }
  0x13   : > { %s676_s21 = scalar_select %p556_p11, 1, 0 }
  0x14   : > { %s567_s27 = scalar_lea.hbm %s670_s0, %s304_s24  ;;  %s107_s28 = scalar_lea.vmem [#allocation2], %s291_s23 }
  0x15   : > { %s117_s29 = sshll.u32 %s107_s28, 4  ;;  %p573_p0 = pnand %p318_p13, %p539_p4  ;;  %s569_s29 = int_to_ptr.vmem [resolvable:$true] %s117_s29 }
  0x16   : > { %s104_s2 = scalar_lea.sflag [#allocation3], %s103_s22  ;;  %s370_s3 = scalar_lea.hbm %s567_s27, 128 }
  0x17   : > { %p371_p3 = scmp.ne.s32.totalorder %s567_s27, %s370_s3  ;;  %p372_p5 = pneg %p573_p0 }
  0x18   : > { %s375_s12 = scalar_lea.hbm %s670_s0, 256  ;;  %p376_p4 = scmp.lt.u32.totalorder %s567_s27, %s670_s0 }
  0x19   : > { %p373_p6 = pnand %p372_p5, %p371_p3  ;;  %p377_p10 = scmp.lt.u32.totalorder %s375_s12, %s370_s3 }
  0x1a   : > { %p379_p12 = scmp.lt.u32.totalorder %s370_s3, %s567_s27 }
  0x1b   : > { %p374_p7 = pneg %p373_p6  ;;  %p378_p13 = por %p377_p10, %p376_p4 }
  0x1d   : > { %p380_p1 = por %p379_p12, %p378_p13 }
  0x1f   : > { %p381_p2 = pnand %p380_p1, %p374_p7 }
  0x21   : > { %384 = shalt.err (!%p381_p2)
}
  0x22   : > { %s385_s16 = scalar_lea.vmem %s569_s29, 128  ;;  %s484_s17 = smov [#allocation2]  }
  0x23   : > { %p386_p3 = scmp.ne.s32.totalorder %s569_s29, %s385_s16  ;;  %s390_s22 = sshll.u32 %s484_s17, 4  ;;  %s391_s22 = int_to_ptr.vmem [resolvable:$false] %s390_s22 }
  0x24   : > { %s392_s23 = scalar_lea.vmem %s391_s22, 256  ;;  %p393_p9 = scmp.lt.s32.totalorder %s569_s29, %s391_s22 }
  0x25   : > { %p388_p6 = pnand %p386_p3, %p372_p5  ;;  %p394_p4 = scmp.lt.s32.totalorder %s392_s23, %s385_s16 }
  0x27   : > { %p389_p11 = pneg %p388_p6  ;;  %p395_p10 = por %p394_p4, %p393_p9 }
  0x29   : > { %p396_p12 = pnand %p395_p10, %p389_p11 }
  0x2b   : > { %399 = shalt.err (!%p396_p12)
}
  0x2c   : > { %313 = dma.hbm_to_vmem [thread:$0]  (!%p573_p0), %s567_s27, 128, %s569_s29, %s104_s2  }
  0x2d   : > { %p678_p1 = scmp.lt.s32.totalorder %s482_s11, 3  ;;  %p679_p2 = scmp.ge.s32.totalorder %s482_s11, 1 }
  0x2f   : > { %p123_p5 = pnand %p679_p2, %p678_p1 }
  0x30   : > { %s609_s24 = sand.u32 (!%p123_p5), 1, %s466_s7  }
  0x31   : > { %126 = sbr.rel (%p123_p5) target bundleno = 84 (0x54), region = 24  ;;  %s295_s25 = sshll.u32 (!%p123_p5), %s609_s24, 3 }
  0x32   : > { %s129_s26 = scalar_lea.sflag (!%p123_p5), [#allocation3], %s609_s24  ;;  %s132_s28 = scalar_lea.vmem (!%p123_p5), [#allocation2], %s295_s25 }
  0x38   : > { %453 = dma.done.wait (%p545_p8), %s129_s26, 128  }
  0x39   : > { %455 = vsyncadd (%p545_p8), %s129_s26, 4294967168  ;;  %v169_v0 = vlaneseq  ;;  %v485_v1 = vmov 1934713408   ;;  %v297_v5 = vld.sshfl [vmem:[%s132_s28] sm:$0xff pattern:$0x76325410] }
  0x3a   : > { %v167_v2 = vunpack.c.l.s4 %v485_v1  ;;  %v162_v6 = vcombine.high %v297_v5, %v297_v5  ;;  %s150_s27 = scalar_lea.vmem [#allocation5], %s295_s25  ;;  %s305_s30 = sshll.u32 %s474_s9, 7  ;;  %v486_v10 = vmov 0.0  }
  0x3b   : > { %v170_v4 = vshrl.u32 %v169_v0, 7  ;;  %s203_s29 = sshll.u32 %s150_s27, 4  ;;  %s623_s3 = scalar_lea.hbm %s671_s1, %s305_s30  ;;  %s618_s29 = int_to_ptr.vmem [resolvable:$true] %s203_s29 }
  0x3c   : > { %v168_v3 = vunpack.c.0.s8 %v167_v2  ;;  %v165_v8 = vcombine.low %v297_v5, %v162_v6  ;;  %s187_s4 = scalar_lea.sflag [#allocation4], %s609_s24  ;;  %s400_s5 = scalar_lea.vmem %s618_s29, 128 }
  0x3d   : > { %p401_p8 = scmp.ne.s32.totalorder %s618_s29, %s400_s5  ;;  %p680_p9 = scmp.ne.s32.totalorder %s675_s19, 0 }
  0x3e   : > { %v171_v7 = vsub.s32 %v168_v3, %v170_v4  ;;  %s487_s9 = smov [#allocation5]  }
  0x3f   : > { %p402_p11 = pnand %p401_p8, %p680_p9  ;;  %s404_s12 = sshll.u32 %s487_s9, 4  ;;  %s405_s12 = int_to_ptr.vmem [resolvable:$false] %s404_s12 }
  0x40   : > { %v172_v9 = vrot.slane %v165_v8, %v171_v7  ;;  %s406_s13 = scalar_lea.vmem %s405_s12, 256  ;;  %p407_p7 = scmp.lt.s32.totalorder %s618_s29, %s405_s12 }
  0x41   : > { %p403_p0 = pneg %p402_p11  ;;  %p408_p13 = scmp.lt.s32.totalorder %s406_s13, %s400_s5 }
  0x42   : > { %v173_v11 = vcombine.high %v172_v9, %v486_v10 }
  0x43   : > { %p409_p3 = por %p408_p13, %p407_p7 }
  0x44   : > { %v176_v12 = vcombine.low %v172_v9, %v173_v11 }
  0x45   : > { %p410_p6 = pnand %p409_p3, %p403_p0 }
  0x46   : > { %298 = vst.sshfl [vmem:[%s150_s27] sm:$0xff pattern:$0x76325410] %v176_v12 }
  0x47   : > { %413 = shalt.err (!%p410_p6)
}
  0x48   : > { %s414_s15 = scalar_lea.hbm %s623_s3, 128  ;;  %s418_s22 = scalar_lea.hbm %s671_s1, 256 }
  0x49   : > { %p415_p4 = scmp.ne.s32.totalorder %s623_s3, %s414_s15  ;;  %p419_p1 = scmp.lt.u32.totalorder %s623_s3, %s671_s1 }
  0x4a   : > { %p420_p2 = scmp.lt.u32.totalorder %s418_s22, %s414_s15  ;;  %p422_p8 = scmp.lt.u32.totalorder %s414_s15, %s623_s3 }
  0x4b   : > { %p416_p10 = pnand %p415_p4, %p680_p9 }
  0x4c   : > { %p421_p5 = por %p420_p2, %p419_p1 }
  0x4d   : > { %p417_p12 = pneg %p416_p10 }
  0x4e   : > { %p423_p11 = por %p422_p8, %p421_p5 }
  0x50   : > { %p424_p0 = pnand %p423_p11, %p417_p12 }
  0x52   : > { %427 = shalt.err (!%p424_p0)
}
  0x53   : > { %308 = dma.vmem_to_hbm [thread:$0]  (%p680_p9), %s618_s29, 128, %s623_s3, %s187_s4  }
  0x54 PF: > { %s215_s25 = sand.u32 1, %s462_s6   ;;  %p681_p7 = scmp.ne.s32.totalorder %s676_s21, 0 }
  0x55   : > { %p682_p13 = scmp.ge.s32.totalorder %s482_s11, 2  ;;  %s216_s26 = scalar_lea.sflag [#allocation4], %s215_s25 }
  0x57   : > { %p315_p3 = pnand %p682_p13, %p681_p7 }
  0x59   : > { %457 = dma.done.wait (!%p315_p3), %s216_s26, 128  }
  0x5a   : > { %459 = vsyncadd (!%p315_p3), %s216_s26, 4294967168  ;;  %s17_s11 = sadd.s32 1, %s482_s11   ;;  %s683_s6 = smov %s466_s7 }
  0x5b   : > { %p14_p6 = scmp.ge.s32.totalorder %s17_s11, 4   ;;  %s684_s7 = smov %s470_s8 }
  0x5c   : > { %s685_s8 = smov %s554_s20  ;;  %s686_s9 = smov %s478_s10 }
  0x5d   : > { %s687_s10 = smov %s689_s14  ;;  %16 = sbr.rel (!%p14_p6) target bundleno = 6 (0x6), region = 69 }
  0x64   :  { %221 = vsyncpa [#allocation3], 1 }
  0x65   :  { %223 = vsyncpa [#allocation3 + $0x1], 1 }
  0x66   :  { %224 = vsyncpa [#allocation4], 1 }
  0x67   :  { %226 = vsyncpa [#allocation4 + $0x1], 1 }

</bundles_post_ra>
